<compile_context>
chip_gen: v6e
topology: v6e:2x2x1
jax: 0.10.0
libtpu: 0.0.40
codegen_flags: <defaults>
</compile_context>

<pallas_src>
import jax
import jax.numpy as jnp
from jax.experimental import pallas as pl
from jax.experimental.pallas import tpu as pltpu


# --------------------------------------------------------------------------- #
# Kernel
# --------------------------------------------------------------------------- #
def sara_linear_kernel(x_ref, az_ref, bt_ref, o_ref, xa_ref):
    # x_ref : (tm, in_features)  tile of flattened input rows   (compute dtype)
    # az_ref: (in_features, r)   lora_A^T with (z * scaling) folded into columns
    # bt_ref: (r, tn)            lora_B^T tile
    # o_ref : (tm, tn)           output tile (x.dtype)
    # xa_ref: (tm, r)            VMEM scratch, carries x @ Az across the j axis
    @pl.when(pl.program_id(1) == 0)
    def _():
        xa = jnp.dot(x_ref[...], az_ref[...],
                     preferred_element_type=jnp.float32)        # (tm, r)
        xa_ref[...] = xa.astype(xa_ref.dtype)

    y = jnp.dot(xa_ref[...], bt_ref[...],
                preferred_element_type=jnp.float32)             # (tm, tn)
    o_ref[...] = y.astype(o_ref.dtype)


# --------------------------------------------------------------------------- #
# Helpers
# --------------------------------------------------------------------------- #
def _round_up(x, m):
    return (x + m - 1) // m * m


def _sublane(dtype):
    # second-to-last block dim must be a multiple of this (or the full dim)
    return {1: 32, 2: 16, 4: 8}.get(jnp.dtype(dtype).itemsize, 8)


def _vmem_limit_bytes():
    """Generation-aware scoped-VMEM limit (conservative fallback = v7x 64 MiB/TC)."""
    cap = 64 * 1024 * 1024
    try:
        info = pltpu.get_tpu_info()
        cap = int(getattr(info, "vmem_capacity_bytes", cap))
    except Exception:
        pass
    return min(cap, 96 * 1024 * 1024)


def _choose_tn(out_features, tm, in_features, r, in_isz, out_isz, budget):
    """Lane-dense out_features tile that keeps the pipeline inside `budget` bytes."""
    def usage(tn):
        return (2 * tm * in_features * in_isz          # x tile, double buffered
                + 2 * tm * tn * out_isz                # out tile, double buffered
                + 2 * (in_features * r + r * tn) * in_isz  # weights (conservative 2x)
                + tm * r * in_isz)                     # xa scratch

    if usage(out_features) <= budget:
        return out_features                            # collapse N grid entirely
    # largest multiple of 128 that fits the budget
    tn_max, t = 128, 128
    while t <= out_features and usage(t) <= budget:
        tn_max, t = t, t + 128
    # prefer a divisor of out_features (no ragged / masked last column block)
    for t in range(tn_max, 127, -128):
        if out_features % t == 0:
            return t
    return tn_max                                      # ragged last block (masked store)


# --------------------------------------------------------------------------- #
# Parameter preparation (do ONCE at load time, not per forward)
# --------------------------------------------------------------------------- #
def prepare_sara_linear_params(lora_A, vector_z, lora_B, scaling,
                               compute_dtype=jnp.bfloat16):
    """Returns (a_z, b_t):
         a_z = A^T * (vector_z * scaling)   shape (in_features, r)
         b_t = B^T                           shape (r, out_features)
       Mathematically: ((x A^T) z) B^T * s == x (A^T diag(z*s)) B^T.
    """
    r = lora_A.shape[0]
    z_scaled = vector_z.astype(jnp.float32) * jnp.float32(scaling)        # (r,)
    a_z = (jnp.transpose(lora_A).astype(jnp.float32) * z_scaled[None, :]) # (in, r)
    b_t = jnp.transpose(lora_B)                                           # (r, out)
    return a_z.astype(compute_dtype), b_t.astype(compute_dtype)


# --------------------------------------------------------------------------- #
# Forward
# --------------------------------------------------------------------------- #
def sara_linear_forward(x, a_z, b_t, *, tm=256, tn=None):
    """Forward of the SaRA LoRA Linear layer (final result == LoRA branch only,
    matching the reference forward which overwrites the base-layer result)."""
    *lead, in_features = x.shape
    in_f2, r = a_z.shape
    r2, out_features = b_t.shape
    assert in_f2 == in_features and r2 == r, "weight shapes inconsistent with x"

    compute_dtype = a_z.dtype
    out_dtype = x.dtype

    M = 1
    for d in lead:
        M *= d
    x2d = x.reshape(M, in_features).astype(compute_dtype)

    in_isz = jnp.dtype(compute_dtype).itemsize
    out_isz = jnp.dtype(out_dtype).itemsize
    sublane = max(_sublane(compute_dtype), _sublane(out_dtype))

    # --- row (M) tile: multiple of the sublane requirement, no padding of x.
    tm_eff = max(sublane, min(int(tm), _round_up(M, sublane)))
    tm_eff = _round_up(tm_eff, sublane)
    # give both v7x TensorCores work when M is big enough but fits one block
    if pl.cdiv(M, tm_eff) == 1 and M >= 8 * sublane:
        tm_eff = _round_up(pl.cdiv(M, 2), sublane)
    m_blocks = pl.cdiv(M, tm_eff)

    # --- out_features (N) tile: VMEM-aware.
    vmem_limit = _vmem_limit_bytes()
    budget = int(vmem_limit * 0.7)
    if tn is None:
        tn = _choose_tn(out_features, tm_eff, in_features, r, in_isz, out_isz, budget)
    n_blocks = pl.cdiv(out_features, tn)

    grid = (m_blocks, n_blocks)

    out2d = pl.pallas_call(
        sara_linear_kernel,
        out_shape=jax.ShapeDtypeStruct((M, out_features), out_dtype),
        grid_spec=pltpu.PrefetchScalarGridSpec(
            num_scalar_prefetch=0,
            grid=grid,
            in_specs=[
                pl.BlockSpec((tm_eff, in_features), lambda i, j: (i, 0)),  # x rows tile
                pl.BlockSpec((in_features, r), lambda i, j: (0, 0)),       # A^T * (z*s), full
                pl.BlockSpec((r, tn), lambda i, j: (0, j)),                # B^T tile
            ],
            out_specs=pl.BlockSpec((tm_eff, tn), lambda i, j: (i, j)),
            scratch_shapes=[pltpu.VMEM((tm_eff, r), compute_dtype)],       # x@Az carry
        ),
        compiler_params=pltpu.CompilerParams(
            dimension_semantics=("parallel", "arbitrary"),
            vmem_limit_bytes=vmem_limit),
    )(x2d, a_z, b_t)

    return out2d.reshape(*lead, out_features)


# --------------------------------------------------------------------------- #
# Self-test
# --------------------------------------------------------------------------- #
if __name__ == "__main__":
    # Module hyper-params (nn.Linear(in_features, out_features) base layer,
    # r-rank adapter, lora_alpha=1, use_rslora=False -> scaling = alpha / r)
    batch, seq = 2, 8
    in_features, out_features, r = 32, 32, 8
    lora_alpha = 1
    scaling = lora_alpha / r

    key = jax.random.PRNGKey(0)
    k_x, k_a, k_b = jax.random.split(key, 3)

    x = jax.random.normal(k_x, (batch, seq, in_features), jnp.float32)
    # Deterministic synthetic weights. (The module's default init zeros lora_B,
    # which would make the output identically zero; use non-zero deterministic
    # values so the kernel path is actually exercised.)
    lora_A = jax.random.normal(k_a, (r, in_features), jnp.float32) * 0.1
    lora_B = jax.random.normal(k_b, (out_features, r), jnp.float32) * 0.1
    vector_z = jnp.ones((r,), jnp.float32)   # nn.Parameter(torch.ones(r))

    # Pure-JAX reference of the exact forward semantics.
    ref = ((x.reshape(-1, in_features) @ lora_A.T) * vector_z) @ lora_B.T * scaling
    ref = ref.reshape(batch, seq, out_features)

    # ---- f32 compute path: tight check of the semantics.
    a_z32, b_t32 = prepare_sara_linear_params(lora_A, vector_z, lora_B, scaling,
                                              compute_dtype=jnp.float32)
    out_f32 = jax.block_until_ready(sara_linear_forward(x, a_z32, b_t32))
    assert out_f32.shape == (batch, seq, out_features)
    assert out_f32.dtype == x.dtype
    assert jnp.allclose(out_f32, ref, atol=1e-4, rtol=1e-4)

    # ---- bf16 compute path (default deployment config, halves HBM traffic).
    a_z, b_t = prepare_sara_linear_params(lora_A, vector_z, lora_B, scaling)
    out_bf16 = jax.block_until_ready(sara_linear_forward(x, a_z, b_t))
    assert out_bf16.shape == (batch, seq, out_features)
    assert out_bf16.dtype == x.dtype
    assert jnp.allclose(out_bf16, ref, atol=5e-3, rtol=5e-2)

    # TODO(synk): the source forward also computes base_layer(x) and then
    # overwrites it (upstream bug); that dead matmul is intentionally omitted.
    print("KERNEL_OK")
</pallas_src>

<mosaic_0001>
module attributes {stable_mosaic.version = 11 : i64} {
  func.func @sara_linear_kernel(%arg0: i32, %arg1: i32, %arg2: memref<16x32xf32, #tpu.memory_space<vmem>>, %arg3: memref<32x8xf32, #tpu.memory_space<vmem>>, %arg4: memref<8x32xf32, #tpu.memory_space<vmem>>, %arg5: memref<16x32xf32, #tpu.memory_space<vmem>>, %arg6: memref<16x8xf32, #tpu.memory_space<vmem>>) attributes {dimension_semantics = [#tpu.dimension_semantics<parallel>, #tpu.dimension_semantics<arbitrary>], iteration_bounds = array<i64: 1, 1>, scalar_prefetch = 0 : i64, scratch_operands = 1 : i64, tpu.core_type = #tpu.core_type<tc>, window_params = [{transform_indices = @transform_0, window_bounds = array<i64: 16, 32>}, {pipeline_mode = #tpu.pipeline_mode<synchronous>, transform_indices = @transform_1, window_bounds = array<i64: 32, 8>}, {transform_indices = @transform_2, window_bounds = array<i64: 8, 32>}, {transform_indices = @transform_3, window_bounds = array<i64: 16, 32>}]} {
    %c0_i32 = arith.constant 0 : i32
    %0 = arith.cmpi eq, %arg1, %c0_i32 : i32
    %1 = arith.extui %0 : i1 to i32
    %c0_i32_0 = arith.constant 0 : i32
    %2 = arith.cmpi ne, %1, %c0_i32_0 : i32
    scf.if %2 {
      %c0_6 = arith.constant 0 : index
      %c0_7 = arith.constant 0 : index
      %7 = vector.load %arg2[%c0_6, %c0_7] : memref<16x32xf32, #tpu.memory_space<vmem>>, vector<16x32xf32>
      %c0_8 = arith.constant 0 : index
      %c0_9 = arith.constant 0 : index
      %8 = vector.load %arg3[%c0_8, %c0_9] : memref<32x8xf32, #tpu.memory_space<vmem>>, vector<32x8xf32>
      %cst_10 = arith.constant dense<0.000000e+00> : vector<16x8xf32>
      %9 = tpu.matmul %7, %8, %cst_10 {dimension_numbers = #tpu.dot_dimension_numbers<[1], [0], [0], [1], [0, 0, 1, 1], [], []>} : vector<16x32xf32>, vector<32x8xf32>, vector<16x8xf32> -> vector<16x8xf32>
      %c0_11 = arith.constant 0 : index
      %c0_12 = arith.constant 0 : index
      %10 = vector.load %arg6[%c0_11, %c0_12] : memref<16x8xf32, #tpu.memory_space<vmem>>, vector<16x8xf32>
      tpu.vector_store %arg6[%c0_11, %c0_12], %9 {strides = array<i32>} : memref<16x8xf32, #tpu.memory_space<vmem>>, vector<16x8xf32>,
    } else {
    }
    %c0 = arith.constant 0 : index
    %c0_1 = arith.constant 0 : index
    %3 = vector.load %arg6[%c0, %c0_1] : memref<16x8xf32, #tpu.memory_space<vmem>>, vector<16x8xf32>
    %c0_2 = arith.constant 0 : index
    %c0_3 = arith.constant 0 : index
    %4 = vector.load %arg4[%c0_2, %c0_3] : memref<8x32xf32, #tpu.memory_space<vmem>>, vector<8x32xf32>
    %cst = arith.constant dense<0.000000e+00> : vector<16x32xf32>
    %5 = tpu.matmul %3, %4, %cst {dimension_numbers = #tpu.dot_dimension_numbers<[1], [0], [0], [1], [0, 0, 1, 1], [], []>} : vector<16x8xf32>, vector<8x32xf32>, vector<16x32xf32> -> vector<16x32xf32>
    %c0_4 = arith.constant 0 : index
    %c0_5 = arith.constant 0 : index
    %6 = vector.load %arg5[%c0_4, %c0_5] : memref<16x32xf32, #tpu.memory_space<vmem>>, vector<16x32xf32>
    tpu.vector_store %arg5[%c0_4, %c0_5], %5 {strides = array<i32>} : memref<16x32xf32, #tpu.memory_space<vmem>>, vector<16x32xf32>,
    return
  }
  func.func @transform_0(%arg0: i32, %arg1: i32) -> (i32, i32) {
    %c0_i32 = arith.constant 0 : i32
    %c0_i32_0 = arith.constant 0 : i32
    return %arg0, %c0_i32 : i32, i32
  }
  func.func @transform_1(%arg0: i32, %arg1: i32) -> (i32, i32) {
    %c0_i32 = arith.constant 0 : i32
    %c0_i32_0 = arith.constant 0 : i32
    %c0_i32_1 = arith.constant 0 : i32
    return %c0_i32, %c0_i32_0 : i32, i32
  }
  func.func @transform_2(%arg0: i32, %arg1: i32) -> (i32, i32) {
    %c0_i32 = arith.constant 0 : i32
    %c0_i32_0 = arith.constant 0 : i32
    return %c0_i32, %arg1 : i32, i32
  }
  func.func @transform_3(%arg0: i32, %arg1: i32) -> (i32, i32) {
    %c0_i32 = arith.constant 0 : i32
    return %arg0, %arg1 : i32, i32
  }
}

</mosaic_0001>

<bundles_post_ra>
// kernel: tpu_custom_call.1
= control target key start
LH: loop header
LB: loop body
LE: loop exit
PB: predicated region body
PF: predicated region fallthrough
CT: control target
= control target key end

     0   :  { %vm25_vm0 = vcmask 261120   ;;  %s319_s0 = inlined_call_operand.vmem [shape: f32[16,32], index: 0, kind: input, shape index: {}]   ;;  %s320_s1 = inlined_call_operand.vmem [shape: f32[32,8], index: 1, kind: input, shape index: {}]   ;;  %s321_s2 = inlined_call_operand.vmem [shape: f32[8,32], index: 2, kind: input, shape index: {}]   ;;  %s322_s3 = inlined_call_operand.hbm [shape: f32[16,32], index: 3, kind: output, shape index: {}]  }
   0x1   :  { %v24_v0 = vld [vmem:[%s320_s1 + $0x18] sm:$0xff]  ;;  %v23_v1 = vld [vmem:[%s320_s1 + $0x10] sm:$0xff]  ;;  %v19_v2 = vld [vmem:[%s319_s0] sm:$0xff] }
   0x2   :  { %227 = vmatprep.subr.mxu0 %v24_v0  ;;  %v22_v3 = vld [vmem:[%s320_s1 + $0x8] sm:$0xff]  ;;  %235 = vmatprep.mubr.msk.f32.mxu0 %vm25_vm0, %v19_v2 }
   0x3   :  { %228 = vmatpush3.msra.mxu0 %v24_v0 }
   0x4   :  { %8 = vsyncpa [#allocation4], 0  ;;  %229 = vmatprep.subr.mxu0 %v23_v1  ;;  %v21_v4 = vld [vmem:[%s320_s1] sm:$0xff]  ;;  %v20_v5 = vld [vmem:[%s319_s0 + $0x8] sm:$0xff]  ;;  %vm107_vm1 = vcmask 64512   ;;  %s268_s0 = smov [#allocation3]  }
   0x5   :  { %230 = vmatpush3.msra.mxu0 %v23_v1  ;;  %v112_v6 = vld [vmem:[%s321_s2] sm:$0xff]  ;;  %s203_s1 = sshll.u32 %s268_s0, 4  ;;  %s204_s1 = int_to_ptr.vmem [resolvable:$true] %s203_s1 }
   0x6   :  { %231 = vmatprep.subr.mxu0 %v22_v3  ;;  %238 = vmatprep.subr.mxu1 %v112_v6  ;;  %s246_s2 = scalar_lea.vmem %s204_s1, 256  ;;  %p251_p1 = scmp.lt.s32.totalorder %s204_s1, %s204_s1 }
   0x7   :  { %232 = vmatpush3.msra.mxu0 %v22_v3  ;;  %239 = vmatpush3.msra.mxu1 %v112_v6  ;;  %p247_p0 = scmp.ne.s32.totalorder %s204_s1, %s246_s2  ;;  %p252_p2 = scmp.lt.s32.totalorder %s246_s2, %s246_s2 }
   0x8   :  { %233 = vmatprep.subr.mxu0 %v21_v4 }
   0x9   :  { %234 = vmatpush3.msra.mxu0 %v21_v4  ;;  %p253_p3 = por %p252_p2, %p251_p1 }
   0xa   :  { %236 = vmatmul.mubr.msk.f32.vlgmr.msra.gmra.mxu0 %vm25_vm0, %v20_v5 }
   0xb   :  { %p254_p4 = pnand %p253_p3, %p247_p0 }
  0xca   :  { %v237_v7 = vpop.f32.mrf.mxu0 }
  0xcb   :  { %109 = vst.msk [vmem:[#allocation2 + $0x8] sm:$0xff] %vm107_vm1, %v237_v7 }
  0xcc   :  { %v98_v8 = vpop.f32.mrf.mxu0 }
  0xcd   :  { %108 = vst.msk [vmem:[#allocation2] sm:$0xff] %vm107_vm1, %v98_v8 }
  0xd2   :  { %v111_v10 = vld [vmem:[#allocation2 + $0x8] sm:$0xff] }
  0xd4   :  { %v110_v9 = vld [vmem:[#allocation2] sm:$0xff] }
  0xd5   :  { %240 = vmatprep.mubr.msk.f32.mxu1 %vm107_vm1, %v110_v9 }
  0xd6   :  { %241 = vmatmul.mubr.msk.f32.vlgmr.msra.gmra.mxu1 %vm107_vm1, %v111_v10 }
 0x196   :  { %v242_v11 = vpop.f32.mrf.mxu1 }
 0x197   :  { %197 = vst.msk [vmem:[#allocation3 + $0x8] sm:$0xff] %vm25_vm0, %v242_v11 }
 0x198   :  { %v186_v12 = vpop.f32.mrf.mxu1 }
 0x199   :  { %196 = vst.msk [vmem:[#allocation3] sm:$0xff] %vm25_vm0, %v186_v12 }
 0x19a   :  { %257 = shalt.err (!%p254_p4)
}
 0x19b   :  { %s269_s26 = smov 128   ;;  %s270_s27 = smov 8  }
 0x19c   :  { %209 = dma.vmem_to_hbm [thread:$0]  %s204_s1, 256, %s322_s3, [#allocation4], %s269_s26, %s269_s26, %s270_s27  }
 0x19d   :  { %266 = dma.done.wait [#allocation4], 256  }
 0x19e   :  { %267 = vsyncadd [#allocation4], 4294967040 }
 0x19f   :  { %213 = vsyncpa [#allocation4], 1 }

</bundles_post_ra>
